<compile_context>
chip_gen: v7x
topology: tpu7x:2x2x1
jax: 0.10.0
libtpu: 0.0.40
codegen_flags: <defaults>
</compile_context>

<pallas_src>
import jax
import jax.numpy as jnp
from jax.experimental import pallas as pl
from jax.experimental.pallas import tpu as pltpu

FEAT_D = 32
HIDDEN = 128          # fixed by the module definition (fc1 -> 128)
BATCH = 8
P_DROP = 0.5
BN_EPS = 1e-5


def netd_confidence_kernel(x_ref, w1_ref, params_ref, mask_ref, out_ref):
    # params_ref rows: 0=b1, 1=gamma, 2=beta, 3=w2_row, 4=[b2, 0, ...] (rows 5..7 padding)
    x = x_ref[...]                                                     # (B, feat_d) f32

    # fc1: (B, feat_d) @ (feat_d, 128) + b1
    h = jnp.dot(x, w1_ref[...], preferred_element_type=jnp.float32) + params_ref[0:1, :]

    # BatchNorm1d(128), training-mode batch stats. var = E[h^2] - E[h]^2 so both sublane
    # reductions issue from independent inputs (no subtract/square between them).
    h2 = h * h
    mean = jnp.mean(h, axis=0, keepdims=True)                          # (1, 128)
    mean_sq = jnp.mean(h2, axis=0, keepdims=True)                      # (1, 128)
    var = mean_sq - mean * mean
    hn = (h - mean) * jax.lax.rsqrt(var + BN_EPS)
    hn = hn * params_ref[1:2, :] + params_ref[2:3, :]

    # Dropout: mask holds 0.0 or 1/(1-p)  ->  single VPU multiply.
    hd = hn * mask_ref[...]

    # fc2: N=1 output -> lane-wise multiply + XLU lane reduction (avoid an MXU round trip).
    w2_row = params_ref[3:4, :]                                        # (1, 128)
    out = jnp.sum(hd * w2_row, axis=-1, keepdims=True) + params_ref[4:5, 0:1]
    out_ref[...] = out


def netd_confidence(x, w1, b1, gamma, beta, w2, b2, dropout_key):
    B = x.shape[0]

    # Pack small per-feature vectors into one lane-dense (8, 128) slab (single DMA).
    params = jnp.zeros((8, HIDDEN), jnp.float32)
    params = params.at[0].set(b1.reshape(-1))
    params = params.at[1].set(gamma.reshape(-1))
    params = params.at[2].set(beta.reshape(-1))
    params = params.at[3].set(w2.reshape(-1))            # w2 as a (128,) row
    params = params.at[4, 0].set(b2.reshape(()))

    # Dropout mask generated outside the kernel (portable; no pltpu PRNG lowering needed).
    keep = jax.random.bernoulli(dropout_key, 1.0 - P_DROP, (B, HIDDEN))
    mask = jnp.where(keep, 1.0 / (1.0 - P_DROP), 0.0).astype(jnp.float32)

    vmem = pl.BlockSpec(memory_space=pltpu.MemorySpace.VMEM)
    return pl.pallas_call(
        netd_confidence_kernel,
        out_shape=jax.ShapeDtypeStruct((B, 1), jnp.float32),
        in_specs=[vmem, vmem, vmem, vmem],
        out_specs=vmem,
    )(x, w1, params, mask)


def init_params(key):
    ks = jax.random.split(key, 6)
    w1 = jax.random.normal(ks[0], (FEAT_D, HIDDEN), jnp.float32) * 0.05
    b1 = jax.random.normal(ks[1], (1, HIDDEN), jnp.float32) * 0.01
    gamma = 1.0 + 0.1 * jax.random.normal(ks[2], (1, HIDDEN), jnp.float32)
    beta = 0.1 * jax.random.normal(ks[3], (1, HIDDEN), jnp.float32)
    w2 = jax.random.normal(ks[4], (HIDDEN, 1), jnp.float32) * 0.05
    b2 = 0.01 * jax.random.normal(ks[5], (1, 1), jnp.float32)
    return w1, b1, gamma, beta, w2, b2


if __name__ == "__main__":
    key = jax.random.PRNGKey(0)
    pkey, xkey, dkey = jax.random.split(key, 3)
    w1, b1, gamma, beta, w2, b2 = init_params(pkey)
    x = jax.random.normal(xkey, (BATCH, FEAT_D), jnp.float32)

    out = netd_confidence(x, w1, b1, gamma, beta, w2, b2, dkey)
    jax.block_until_ready(out)
    assert out.shape == (BATCH, 1) and out.dtype == jnp.float32
    assert bool(jnp.all(jnp.isfinite(out)))
    print("KERNEL_OK")
</pallas_src>

<mosaic_0001>
module attributes {stable_mosaic.version = 11 : i64} {
  func.func @netd_confidence_kernel(%arg0: memref<8x32xf32, #tpu.memory_space<vmem>>, %arg1: memref<32x128xf32, #tpu.memory_space<vmem>>, %arg2: memref<8x128xf32, #tpu.memory_space<vmem>>, %arg3: memref<8x128xf32, #tpu.memory_space<vmem>>, %arg4: memref<8x1xf32, #tpu.memory_space<vmem>>) attributes {dimension_semantics = [], scalar_prefetch = 0 : i64, scratch_operands = 0 : i64, tpu.core_type = #tpu.core_type<tc>} {
    %c0 = arith.constant 0 : index
    %c0_0 = arith.constant 0 : index
    %0 = vector.load %arg0[%c0, %c0_0] : memref<8x32xf32, #tpu.memory_space<vmem>>, vector<8x32xf32>
    %c0_1 = arith.constant 0 : index
    %c0_2 = arith.constant 0 : index
    %1 = vector.load %arg1[%c0_1, %c0_2] : memref<32x128xf32, #tpu.memory_space<vmem>>, vector<32x128xf32>
    %cst = arith.constant dense<0.000000e+00> : vector<8x128xf32>
    %2 = tpu.matmul %0, %1, %cst {dimension_numbers = #tpu.dot_dimension_numbers<[1], [0], [0], [1], [0, 0, 1, 1], [], []>} : vector<8x32xf32>, vector<32x128xf32>, vector<8x128xf32> -> vector<8x128xf32>
    %c0_3 = arith.constant 0 : index
    %c0_4 = arith.constant 0 : index
    %3 = vector.load %arg2[%c0_3, %c0_4] : memref<8x128xf32, #tpu.memory_space<vmem>>, vector<1x128xf32>
    %4 = vector.broadcast %3 : vector<1x128xf32> to vector<8x128xf32>
    %5 = arith.addf %2, %4 : vector<8x128xf32>
    %6 = arith.mulf %5, %5 : vector<8x128xf32>
    %cst_5 = arith.constant dense<0.000000e+00> : vector<128xf32>
    %7 = vector.multi_reduction <add>, %5, %cst_5 [0] : vector<8x128xf32> to vector<128xf32>
    %8 = vector.shape_cast %7 : vector<128xf32> to vector<1x128xf32>
    %cst_6 = arith.constant 8.000000e+00 : f32
    %9 = vector.broadcast %cst_6 : f32 to vector<1x128xf32>
    %10 = arith.divf %8, %9 : vector<1x128xf32>
    %cst_7 = arith.constant dense<0.000000e+00> : vector<128xf32>
    %11 = vector.multi_reduction <add>, %6, %cst_7 [0] : vector<8x128xf32> to vector<128xf32>
    %12 = vector.shape_cast %11 : vector<128xf32> to vector<1x128xf32>
    %cst_8 = arith.constant 8.000000e+00 : f32
    %13 = vector.broadcast %cst_8 : f32 to vector<1x128xf32>
    %14 = arith.divf %12, %13 : vector<1x128xf32>
    %15 = arith.mulf %10, %10 : vector<1x128xf32>
    %16 = arith.subf %14, %15 : vector<1x128xf32>
    %17 = vector.broadcast %10 : vector<1x128xf32> to vector<8x128xf32>
    %18 = arith.subf %5, %17 : vector<8x128xf32>
    %cst_9 = arith.constant 9.99999974E-6 : f32
    %19 = vector.broadcast %cst_9 : f32 to vector<1x128xf32>
    %20 = arith.addf %16, %19 : vector<1x128xf32>
    %21 = math.rsqrt %20 : vector<1x128xf32>
    %22 = vector.broadcast %21 : vector<1x128xf32> to vector<8x128xf32>
    %23 = arith.mulf %18, %22 : vector<8x128xf32>
    %c1 = arith.constant 1 : index
    %c0_10 = arith.constant 0 : index
    %24 = vector.load %arg2[%c1, %c0_10] : memref<8x128xf32, #tpu.memory_space<vmem>>, vector<1x128xf32>
    %25 = vector.broadcast %24 : vector<1x128xf32> to vector<8x128xf32>
    %26 = arith.mulf %23, %25 : vector<8x128xf32>
    %c2 = arith.constant 2 : index
    %c0_11 = arith.constant 0 : index
    %27 = vector.load %arg2[%c2, %c0_11] : memref<8x128xf32, #tpu.memory_space<vmem>>, vector<1x128xf32>
    %28 = vector.broadcast %27 : vector<1x128xf32> to vector<8x128xf32>
    %29 = arith.addf %26, %28 : vector<8x128xf32>
    %c0_12 = arith.constant 0 : index
    %c0_13 = arith.constant 0 : index
    %30 = vector.load %arg3[%c0_12, %c0_13] : memref<8x128xf32, #tpu.memory_space<vmem>>, vector<8x128xf32>
    %31 = arith.mulf %29, %30 : vector<8x128xf32>
    %c3 = arith.constant 3 : index
    %c0_14 = arith.constant 0 : index
    %32 = vector.load %arg2[%c3, %c0_14] : memref<8x128xf32, #tpu.memory_space<vmem>>, vector<1x128xf32>
    %33 = vector.broadcast %32 : vector<1x128xf32> to vector<8x128xf32>
    %34 = arith.mulf %31, %33 : vector<8x128xf32>
    %cst_15 = arith.constant dense<0.000000e+00> : vector<8xf32>
    %35 = vector.multi_reduction <add>, %34, %cst_15 [1] : vector<8x128xf32> to vector<8xf32>
    %36 = vector.shape_cast %35 : vector<8xf32> to vector<8x1xf32>
    %c4 = arith.constant 4 : index
    %c0_16 = arith.constant 0 : index
    %37 = vector.load %arg2[%c4, %c0_16] : memref<8x128xf32, #tpu.memory_space<vmem>>, vector<1x1xf32>
    %38 = vector.broadcast %37 : vector<1x1xf32> to vector<8x1xf32>
    %39 = arith.addf %36, %38 : vector<8x1xf32>
    %c0_17 = arith.constant 0 : index
    %c0_18 = arith.constant 0 : index
    %40 = vector.load %arg4[%c0_17, %c0_18] : memref<8x1xf32, #tpu.memory_space<vmem>>, vector<8x1xf32>
    tpu.vector_store %arg4[%c0_17, %c0_18], %39 {strides = array<i32>} : memref<8x1xf32, #tpu.memory_space<vmem>>, vector<8x1xf32>,
    return
  }
}

</mosaic_0001>

<bundles_post_ra>
// kernel: tpu_custom_call.1
= control target key start
LH: loop header
LB: loop body
LE: loop exit
PB: predicated region body
PF: predicated region fallthrough
CT: control target
= control target key end

     0   :  { %9 = vsyncpa [#allocation3], 0  ;;  %s379_s0 = inlined_call_operand.hbm [shape: f32[8,32], index: 0, kind: input, shape index: {}]   ;;  %s380_s1 = inlined_call_operand.hbm [shape: f32[32,128], index: 1, kind: input, shape index: {}]   ;;  %s381_s2 = inlined_call_operand.hbm [shape: f32[8,128], index: 2, kind: input, shape index: {}]   ;;  %s382_s3 = inlined_call_operand.vmem [shape: f32[8,128], index: 3, kind: input, shape index: {}]   ;;  %s383_s4 = inlined_call_operand.vmem [shape: f32[8,1], index: 4, kind: output, shape index: {}]  }
   0x1   :  { %10 = vsyncpa [#allocation5], 0  ;;  %s304_s15 = smov [#allocation4]   ;;  %s234_s19 = scalar_lea.hbm %s380_s1, 512 }
   0x2   :  { %s26_s16 = sshll.u32 %s304_s15, 4  ;;  %p235_p0 = scmp.ne.s32.totalorder %s380_s1, %s234_s19  ;;  %s27_s16 = int_to_ptr.vmem [resolvable:$true] %s26_s16 }
   0x3   :  { %p238_p1 = scmp.lt.u32.totalorder %s234_s19, %s380_s1 }
   0x5   :  { %p240_p2 = pnand %p238_p1, %p235_p0 }
   0x7   :  { %243 = shalt.err (!%p240_p2)
}
   0x8   :  { %s244_s24 = scalar_lea.vmem %s27_s16, 512  ;;  %p249_p4 = scmp.lt.s32.totalorder %s27_s16, %s27_s16 }
   0x9   :  { %p245_p3 = scmp.ne.s32.totalorder %s27_s16, %s244_s24  ;;  %p250_p5 = scmp.lt.s32.totalorder %s244_s24, %s244_s24 }
   0xb   :  { %p251_p6 = por %p250_p5, %p249_p4 }
   0xd   :  { %p252_p7 = pnand %p251_p6, %p245_p3 }
   0xf   :  { %255 = shalt.err (!%p252_p7)
}
  0x10   :  { %s305_s25 = smov 128   ;;  %s306_s26 = smov 8  }
  0x11   :  { %32 = dma.hbm_to_vmem [thread:$0]  %s380_s1, 512, %s27_s16, [#allocation5], %s305_s25, %s305_s25, %s306_s26  }
  0x12   :  { %s307_s29 = smov [#allocation2]   ;;  %s308_s5 = smov [#allocation6]  }
  0x13   :  { %s17_s30 = sshll.u32 %s307_s29, 4  ;;  %s39_s6 = sshll.u32 %s308_s5, 4  ;;  %s18_s30 = int_to_ptr.vmem [resolvable:$true] %s17_s30  ;;  %s40_s6 = int_to_ptr.vmem [resolvable:$true] %s39_s6 }
  0x14   :  { %s256_s9 = scalar_lea.hbm %s379_s0, 128 }
  0x15   :  { %p257_p8 = scmp.ne.s32.totalorder %s379_s0, %s256_s9  ;;  %p260_p9 = scmp.lt.u32.totalorder %s256_s9, %s379_s0 }
  0x17   :  { %p262_p10 = pnand %p260_p9, %p257_p8 }
  0x19   :  { %265 = shalt.err (!%p262_p10)
}
  0x1a   :  { %s266_s1 = scalar_lea.vmem %s18_s30, 128  ;;  %p271_p12 = scmp.lt.s32.totalorder %s18_s30, %s18_s30 }
  0x1b   :  { %p267_p11 = scmp.ne.s32.totalorder %s18_s30, %s266_s1  ;;  %p272_p13 = scmp.lt.s32.totalorder %s266_s1, %s266_s1 }
  0x1d   :  { %p273_p0 = por %p272_p13, %p271_p12 }
  0x1f   :  { %p274_p1 = pnand %p273_p0, %p267_p11 }
  0x21   :  { %277 = shalt.err (!%p274_p1)
}
  0x22   :  { %20 = dma.hbm_to_vmem [thread:$0]  %s379_s0, 128, %s18_s30, [#allocation3]  }
  0x23   :  { %s278_s18 = scalar_lea.hbm %s381_s2, 128 }
  0x24   :  { %p279_p2 = scmp.ne.s32.totalorder %s381_s2, %s278_s18  ;;  %p282_p3 = scmp.lt.u32.totalorder %s278_s18, %s381_s2 }
  0x26   :  { %p284_p4 = pnand %p282_p3, %p279_p2 }
  0x28   :  { %287 = shalt.err (!%p284_p4)
}
  0x29   :  { %s288_s23 = scalar_lea.vmem %s40_s6, 128  ;;  %p293_p6 = scmp.lt.s32.totalorder %s40_s6, %s40_s6 }
  0x2a   :  { %p289_p5 = scmp.ne.s32.totalorder %s40_s6, %s288_s23  ;;  %p294_p7 = scmp.lt.s32.totalorder %s288_s23, %s288_s23 }
  0x2c   :  { %p295_p8 = por %p294_p7, %p293_p6 }
  0x2e   :  { %p296_p9 = pnand %p295_p8, %p289_p5 }
  0x30   :  { %299 = shalt.err (!%p296_p9)
}
  0x31   :  { %42 = dma.hbm_to_vmem [thread:$0]  %s381_s2, 128, %s40_s6, [#allocation5]  }
  0x32   :  { %300 = dma.done.wait [#allocation3], 128  }
  0x33   :  { %301 = vsyncadd [#allocation3], 4294967168 }
  0x34   :  { %302 = dma.done.wait [#allocation5], 640  }
  0x35   :  { %303 = vsyncadd [#allocation5], 4294966656  ;;  %v309_v0 = vmov 0.0|0.0   ;;  %vm310_vm0 = vmmov 0   ;;  %v311_v1 = vmov 0.0   ;;  %v55_v2 = vld [vmem:[#allocation4] sm:$0xff] }
  0x36   :  { %218 = vmatprep.subr.bf16.mxu0 %v309_v0  ;;  %215 = vmatprep.mubr.msk.f32.mxu0 %vm310_vm0, %v311_v1  ;;  %v56_v3 = vld [vmem:[#allocation4 + $0x8] sm:$0xff]  ;;  %v57_v4 = vld [vmem:[#allocation4 + $0x10] sm:$0xff]  ;;  %v58_v6 = vld [vmem:[#allocation4 + $0x18] sm:$0xff]  ;;  %vm64_vm1 = vcmask 261120   ;;  %vm188_vm2 = vcmask 7168  }
  0x37   :  { %v219_v5 = vpack.c.bf16 %v56_v3, %v55_v2  ;;  %v222_v7 = vpack.c.bf16 %v58_v6, %v57_v4  ;;  %v54_v8 = vld [vmem:[#allocation2] sm:$0xff]  ;;  %v196_v9 = vld [vmem:[#allocation6] ss:$0 sm:$0xff]  ;;  %v198_v33 = vld [vmem:[#allocation6 + $0x1] ss:$0 sm:$0xff] }
  0x38   :  { %v199_v35 = vld [vmem:[#allocation6 + $0x2] ss:$0 sm:$0xff]  ;;  %v172_v37 = vld [vmem:[%s382_s3] sm:$0xff]  ;;  %v200_v39 = vld [vmem:[#allocation6 + $0x3] ss:$0 sm:$0xff] }
  0x39   :  { %220 = vmatpush3.bf16.msra.mxu0 %v219_v5  ;;  %v201_v42 = vld [vmem:[#allocation6 + $0x4] ss:$0 sm:$0xff] }
  0x3a   :  { %221 = vmatprep.subr.bf16.mxu0 %v309_v0 }
  0x3d   :  { %223 = vmatpush3.bf16.msra.mxu0 %v222_v7 }
  0x40   :  { %216 = vmatmul.mubr.msk.f32.vlgmr.msra.gmra.mrb[0].mxu0 %vm64_vm1, %v54_v8 }
 0x113   :  { %v134_v10 = vpop.f32.mrb[0].mxu0 }
 0x114   :  { %v135_v11 = vadd.f32 %v196_v9, %v134_v10  ;;  %v217_v12 = vpop.f32.mrb[1].mxu0 }
 0x116   :  { %v138_v13 = vmul.f32 %v135_v11, %v135_v11  ;;  %v139_v14 = vrot.slane %v135_v11, 4 }
 0x118   :  { %v140_v15 = vadd.f32 %v139_v14, %v135_v11  ;;  %v147_v16 = vrot.slane %v138_v13, 4 }
 0x11a   :  { %v141_v17 = vrot.slane %v140_v15, 2  ;;  %v148_v18 = vadd.f32 %v147_v16, %v138_v13 }
 0x11c   :  { %v142_v19 = vadd.f32 %v141_v17, %v140_v15  ;;  %v149_v20 = vrot.slane %v148_v18, 2 }
 0x11e   :  { %v143_v21 = vrot.slane %v142_v19, 1  ;;  %v150_v22 = vadd.f32 %v149_v20, %v148_v18 }
 0x120   :  { %v144_v23 = vadd.f32 %v143_v21, %v142_v19  ;;  %v151_v24 = vrot.slane %v150_v22, 1 }
 0x122   :  { %v146_v25 = vmul.f32 0.125, %v144_v23  ;;  %v152_v26 = vadd.f32 %v151_v24, %v150_v22 }
 0x124   :  { %v153_v27 = vmul.f32 0.125, %v152_v26  ;;  %v154_v28 = vmul.f32 %v146_v25, %v146_v25  ;;  %v156_v31 = vsub.f32 %v135_v11, %v146_v25 }
 0x126   :  { %v155_v29 = vsub.f32 %v153_v27, %v154_v28 }
 0x128   :  { %v157_v30 = vadd.f32 1e-05, %v155_v29 }
 0x12a   :  { %232 = vrsqrt.f32 %v157_v30 }
 0x134   :  { %v233_v32 = vpop.eup %232 }
 0x135   :  { %v159_v34 = vmul.f32 %v233_v32, %v156_v31 }
 0x137   :  { %v165_v36 = vmul.f32 %v198_v33, %v159_v34 }
 0x139   :  { %v171_v38 = vadd.f32 %v199_v35, %v165_v36 }
 0x13b   :  { %v173_v40 = vmul.f32 %v172_v37, %v171_v38 }
 0x13d   :  { %v179_v41 = vmul.f32 %v200_v39, %v173_v40 }
 0x13f   :  { %180 = vadd.xlane.f32.xlu0 %v179_v41 }
 0x1cc   :  { %v181_v43 = vpop.xlane.xlu0 %180 }
 0x1cd   :  { %v187_v44 = vadd.f32 %v201_v42, %v181_v43 }
 0x1cf   :  { %189 = vst.msk [vmem:[%s383_s4] sm:$0xff] %vm188_vm2, %v187_v44 }
 0x1d0   :  { %194 = vsyncpa [#allocation3], 1 }
 0x1d1   :  { %195 = vsyncpa [#allocation5], 1 }

</bundles_post_ra>
